<compile_context>
chip_gen: v7x
topology: tpu7x:2x2x1
jax: 0.10.0
libtpu: 0.0.40
codegen_flags: <defaults>
</compile_context>

<pallas_src>
import math

import jax
import jax.numpy as jnp
from jax.experimental import pallas as pl
from jax.experimental.pallas import tpu as pltpu

SQRT2 = 2.0 ** 0.5
LANE = 128


def _round_up(n, m):
    return ((n + m - 1) // m) * m


# ----------------------------- parameter setup ------------------------------
def cayley(W):
    """JAX port of the PyTorch cayley() for 2-D W of shape (cout, cin)."""
    cout, cin = W.shape
    if cin > cout:
        return cayley(W.T).T
    U, V = W[:cin], W[cin:]
    I = jnp.eye(cin, dtype=W.dtype)
    A = U - U.T + V.T @ V
    iIpA = jnp.linalg.inv(I + A)
    return jnp.concatenate([iIpA @ (I - A), -2.0 * V @ iIpA], axis=0)


def init_params(key, d_model, dim_amp, psi_scale=0.1):
    """Raw (unfolded) parameters matching the module's shapes.

    At init alpha = ||W||, so Q = cayley(W) reproduces the module's cached Q.
    The module initializes psi to zeros; here we use small random psi so the
    exp(+/-psi) folding is actually exercised against the reference.
    """
    hidden = dim_amp * d_model
    ks = jax.random.split(key, 7)

    def linear_w(k, fout, fin):  # nn.Linear default init: U(-1/sqrt(fin), 1/sqrt(fin))
        bound = 1.0 / math.sqrt(fin)
        return jax.random.uniform(k, (fout, fin), jnp.float32, -bound, bound)

    W1 = linear_w(ks[0], hidden, d_model + hidden)     # SandwichFc(d_model, hidden)
    W2 = linear_w(ks[1], hidden, hidden + hidden)      # SandwichFc(hidden, hidden)
    W3 = linear_w(ks[2], hidden, hidden + hidden)      # SandwichFc(hidden, hidden)
    W4 = linear_w(ks[3], d_model, hidden + d_model)    # SandwichLin(hidden, d_model)

    Q1, Q2, Q3, Q4 = cayley(W1), cayley(W2), cayley(W3), cayley(W4)

    def psi(k):
        return psi_scale * jax.random.normal(k, (1, hidden), jnp.float32)

    return dict(
        w1=Q1[:, hidden:].T, a1=Q1[:, :hidden], psi1=psi(ks[4]),
        w2=Q2[:, hidden:].T, a2=Q2[:, :hidden], psi2=psi(ks[5]),
        w3=Q3[:, hidden:].T, a3=Q3[:, :hidden], psi3=psi(ks[6]),
        w4=Q4[:, d_model:].T,
    )


def prepare_params(params, d_model, hidden, scale=1.0,
                   compute_dtype=jnp.bfloat16, lane=LANE):
    """Fold psi / sqrt(2) / scale into the weights (in f32) and pad to lanes.

    Per SandwichFc layer (bias=False):
        y = relu((in_scale * h) @ w * exp(-psi) * sqrt(2)) * exp(psi)
        h = sqrt(2) * (y @ a)
    is exactly  h = relu(h @ w_f) @ a_f  with
        w_f[:, j] = in_scale * sqrt(2) * exp(-psi_j) * w[:, j]
        a_f[j, :] = sqrt(2) * exp( psi_j) * a[j, :]
    FirstChannel's scale + layer 1's own scale give in_scale = scale**2 there.
    SandwichLin (AB=False, bias=False):  out = h @ (scale * w4).

    The fold is carried out in f32 and only cast afterwards; for very large
    |psi| the bf16 cast of folded columns could still under/overflow -- clamp
    psi upstream if that regime matters.
    """
    d_pad = _round_up(d_model, lane)
    h_pad = _round_up(hidden, lane)

    def fold_fc(w, a, psi, in_scale):
        w_f = (in_scale * SQRT2) * w * jnp.exp(-psi)   # scale columns of (fin, hidden)
        a_f = SQRT2 * jnp.exp(psi).T * a               # scale rows of (hidden, hidden)
        return w_f, a_f

    w1, a1 = fold_fc(params["w1"], params["a1"], params["psi1"], scale * scale)
    w2, a2 = fold_fc(params["w2"], params["a2"], params["psi2"], scale)
    w3, a3 = fold_fc(params["w3"], params["a3"], params["psi3"], scale)
    w4 = scale * params["w4"]

    def pad(m, rows, cols):
        out = jnp.zeros((rows, cols), jnp.float32)
        out = out.at[:m.shape[0], :m.shape[1]].set(m)
        return out.astype(compute_dtype)

    weights = (pad(w1, d_pad, h_pad), pad(a1, h_pad, h_pad),
               pad(w2, h_pad, h_pad), pad(a2, h_pad, h_pad),
               pad(w3, h_pad, h_pad), pad(a3, h_pad, h_pad),
               pad(w4, h_pad, d_pad))
    return dict(weights=weights, d_model=d_model, hidden=hidden,
                d_pad=d_pad, h_pad=h_pad, compute_dtype=compute_dtype)


# --------------------------------- kernel -----------------------------------
def lmlp_kernel(x_ref,
                w1_ref, a1_ref, w2_ref, a2_ref, w3_ref, a3_ref, w4_ref,
                o_ref):
    # All psi / sqrt(2) / scale factors are pre-folded into the weights, so the
    # per-tile work is 7 MXU matmuls + 3 relus, accumulated in f32.  Relu stays
    # in f32 (no bf16 VALU on v5e); the bf16 pack/unpack rides VPU slack under
    # the MXU-bound loop.
    cdt = x_ref.dtype
    h = x_ref[...]                                              # (TILE_B, d_pad)
    for w_ref, a_ref in ((w1_ref, a1_ref), (w2_ref, a2_ref), (w3_ref, a3_ref)):
        y = jnp.dot(h, w_ref[...], preferred_element_type=jnp.float32)
        y = jnp.maximum(y, 0.0).astype(cdt)
        h = jnp.dot(y, a_ref[...], preferred_element_type=jnp.float32).astype(cdt)
    o_ref[...] = jnp.dot(h, w4_ref[...],
                         preferred_element_type=jnp.float32).astype(o_ref.dtype)
    # nn.Dropout(p=0) / nn.Identity is a no-op at inference.
    # TODO(synk): for hidden so large the folded weights exceed the per-chip
    # VMEM budget (esp. v7x, 64 MiB/TC), add a K-split variant that streams
    # weight slices from HBM into a VMEM f32 accumulator.


# ------------------------------ sizing helpers -------------------------------
def _vmem_ceiling_bytes():
    """Per-generation usable-VMEM ceiling (leaves Mosaic scratch headroom)."""
    kind = ""
    try:
        kind = jax.devices()[0].device_kind.lower()
    except Exception:
        pass
    if "v7" in kind:
        phys = 64 << 20                      # v7x: 64 MiB per TensorCore
    elif any(t in kind for t in ("v6", "v5", "v4")):
        phys = 128 << 20                     # v4 / v5e / v6e: 128 MiB
    else:
        phys = 64 << 20                      # conservative default
    return (phys * 3) // 4                   # ~48 MiB on v7x, ~96 MiB otherwise


def _weight_specs(weights):
    """VMEM-resident weights: constant block index -> single buffer suffices."""
    if hasattr(pl, "Buffered"):
        try:
            specs = [pl.BlockSpec(w.shape, lambda i: (0, 0),
                                  pipeline_mode=pl.Buffered(1)) for w in weights]
            return specs, 1
        except TypeError:                    # older jax without pipeline_mode kwarg
            pass
    return [pl.BlockSpec(w.shape, lambda i: (0, 0)) for w in weights], 2


# -------------------------------- wrapper -----------------------------------
def lmlp_forward(x, prep, *, tile_b=256):
    d_model = prep["d_model"]
    d_pad, h_pad = prep["d_pad"], prep["h_pad"]
    cdt = prep["compute_dtype"]
    weights = prep["weights"]
    itemsize = jnp.dtype(cdt).itemsize

    batch = x.shape[0]
    w_specs, w_bufs = _weight_specs(weights)
    weight_bytes = sum(int(w.size) * itemsize for w in weights)
    ceiling = _vmem_ceiling_bytes()

    # Accurate VMEM estimate: resident weights x actual buffer count,
    # in/out tiles x 2 buffers, plus the live per-tile intermediates.
    def vmem_needed(tb):
        io = 2 * (2 * tb * d_pad * itemsize)                    # in + out, double-buffered
        live = 2 * tb * h_pad * 4 + 2 * tb * h_pad * itemsize   # f32 y/acc + cdt h
        return w_bufs * weight_bytes + io + live + (1 << 20)    # + 1 MiB slack

    # Batch tile: 256 amortizes MXU fill/drain and per-step overhead on the
    # 256-wide-MXU chips; clamp to the (padded) batch and back off if VMEM-tight.
    tb = max(8, min(_round_up(tile_b, 8), _round_up(batch, 8)))
    while vmem_needed(tb) > ceiling and tb > 8:
        tb = max(8, tb // 2)
    vmem_req = vmem_needed(tb)
    # TODO(synk): when the resident weights alone exceed the ceiling, switch to
    # a K-split weight-streaming grid instead of failing.
    assert vmem_req <= ceiling, (
        f"LMLP folded weights ({weight_bytes >> 20} MiB x {w_bufs} buffer(s)) + tiles "
        f"exceed the {ceiling >> 20} MiB VMEM budget; a K-split fallback is required.")
    vmem_limit = int(min(ceiling, max(32 << 20, vmem_req + vmem_req // 4)))

    batch_pad = _round_up(batch, tb)
    nb = batch_pad // tb

    # Input glue: cast + pad only what is actually needed.  Real data in lanes
    # [d_model, d_pad) is annihilated by w1's zero-padded rows, so no zeroing
    # of those lanes is required; only the batch tail / missing lanes are padded.
    xs = x
    if xs.shape[1] > d_pad:
        xs = xs[:, :d_pad]
    if xs.dtype != cdt:
        xs = xs.astype(cdt)
    if xs.shape[0] != batch_pad or xs.shape[1] != d_pad:
        xs = jnp.pad(xs, ((0, batch_pad - xs.shape[0]), (0, d_pad - xs.shape[1])))

    in_specs = [pl.BlockSpec((tb, d_pad), lambda i: (i, 0))] + w_specs
    out_specs = pl.BlockSpec((tb, d_pad), lambda i: (i, 0))

    flops = 2 * batch_pad * (2 * d_pad * h_pad + 5 * h_pad * h_pad)
    bytes_accessed = weight_bytes + 2 * batch_pad * d_pad * itemsize  # weights + in + out
    cost = pl.CostEstimate(flops=flops, transcendentals=0,
                           bytes_accessed=bytes_accessed)

    out_pad = pl.pallas_call(
        lmlp_kernel,
        out_shape=jax.ShapeDtypeStruct((batch_pad, d_pad), cdt),   # compute dtype out
        grid=(nb,),
        in_specs=in_specs,
        out_specs=out_specs,
        compiler_params=pltpu.CompilerParams(
            dimension_semantics=("parallel",),   # batch tiles are independent
            vmem_limit_bytes=vmem_limit),
        cost_estimate=cost,
    )(xs, *weights)

    return out_pad[:batch, :d_model]


# ----------------------------- pure-JAX reference ---------------------------
def lmlp_ref(x, params, d_model, scale=1.0):
    h = scale * x[:, :d_model].astype(jnp.float32)           # FirstChannel
    for w, a, psi in [(params["w1"], params["a1"], params["psi1"]),
                      (params["w2"], params["a2"], params["psi2"]),
                      (params["w3"], params["a3"], params["psi3"])]:
        y = (scale * h) @ w
        y = jnp.maximum(y * jnp.exp(-psi) * SQRT2, 0.0) * jnp.exp(psi)
        h = SQRT2 * (y @ a)
    return (scale * h) @ params["w4"]                        # SandwichLin, AB/bias False


if __name__ == "__main__":
    d_model, dim_amp, scale = 8, 4, 0.9        # hidden = 32; scale != 1 exercises folding
    hidden = dim_amp * d_model
    batch, in_features = 4, 12                 # in_features > d_model exercises FirstChannel

    key = jax.random.PRNGKey(0)
    k_x, k_p = jax.random.split(key)
    x = jax.random.normal(k_x, (batch, in_features), jnp.float32)
    params = init_params(k_p, d_model, dim_amp)

    ref = lmlp_ref(x, params, d_model, scale)

    # f32 path: tight check of the psi/scale/sqrt(2) folding + lane padding.
    prep32 = prepare_params(params, d_model, hidden, scale, compute_dtype=jnp.float32)
    out32 = jax.block_until_ready(lmlp_forward(x, prep32))
    assert out32.shape == (batch, d_model)
    assert jnp.allclose(out32, ref, atol=1e-4, rtol=1e-4), "f32 mismatch vs reference"

    # bf16 weights/activations (MXU-native), f32 accumulation: looser tolerance
    # (6 f32<->bf16 activation round-trips between the 7 matmuls).
    prep16 = prepare_params(params, d_model, hidden, scale, compute_dtype=jnp.bfloat16)
    out16 = jax.block_until_ready(lmlp_forward(x, prep16))
    assert out16.shape == (batch, d_model)
    assert jnp.allclose(out16.astype(jnp.float32), ref, atol=1e-1, rtol=1e-1), \
        "bf16 mismatch vs reference"

    print("KERNEL_OK")
</pallas_src>

<mosaic_0001>
module attributes {stable_mosaic.version = 11 : i64} {
  func.func @lmlp_kernel(%arg0: i32, %arg1: memref<8x128xf32, #tpu.memory_space<vmem>>, %arg2: memref<128x128xf32, #tpu.memory_space<vmem>>, %arg3: memref<128x128xf32, #tpu.memory_space<vmem>>, %arg4: memref<128x128xf32, #tpu.memory_space<vmem>>, %arg5: memref<128x128xf32, #tpu.memory_space<vmem>>, %arg6: memref<128x128xf32, #tpu.memory_space<vmem>>, %arg7: memref<128x128xf32, #tpu.memory_space<vmem>>, %arg8: memref<128x128xf32, #tpu.memory_space<vmem>>, %arg9: memref<8x128xf32, #tpu.memory_space<vmem>>) attributes {dimension_semantics = [#tpu.dimension_semantics<parallel>], iteration_bounds = array<i64: 1>, scalar_prefetch = 0 : i64, scratch_operands = 0 : i64, tpu.core_type = #tpu.core_type<tc>, window_params = [{transform_indices = @transform_0, window_bounds = array<i64: 8, 128>}, {pipeline_mode = #tpu.pipeline_mode<synchronous>, transform_indices = @transform_1, window_bounds = array<i64: 128, 128>}, {pipeline_mode = #tpu.pipeline_mode<synchronous>, transform_indices = @transform_2, window_bounds = array<i64: 128, 128>}, {pipeline_mode = #tpu.pipeline_mode<synchronous>, transform_indices = @transform_3, window_bounds = array<i64: 128, 128>}, {pipeline_mode = #tpu.pipeline_mode<synchronous>, transform_indices = @transform_4, window_bounds = array<i64: 128, 128>}, {pipeline_mode = #tpu.pipeline_mode<synchronous>, transform_indices = @transform_5, window_bounds = array<i64: 128, 128>}, {pipeline_mode = #tpu.pipeline_mode<synchronous>, transform_indices = @transform_6, window_bounds = array<i64: 128, 128>}, {pipeline_mode = #tpu.pipeline_mode<synchronous>, transform_indices = @transform_7, window_bounds = array<i64: 128, 128>}, {transform_indices = @transform_8, window_bounds = array<i64: 8, 128>}]} {
    %c0 = arith.constant 0 : index
    %c0_0 = arith.constant 0 : index
    %0 = vector.load %arg1[%c0, %c0_0] : memref<8x128xf32, #tpu.memory_space<vmem>>, vector<8x128xf32>
    %c0_1 = arith.constant 0 : index
    %c0_2 = arith.constant 0 : index
    %1 = vector.load %arg2[%c0_1, %c0_2] : memref<128x128xf32, #tpu.memory_space<vmem>>, vector<128x128xf32>
    %cst = arith.constant dense<0.000000e+00> : vector<8x128xf32>
    %2 = tpu.matmul %0, %1, %cst {dimension_numbers = #tpu.dot_dimension_numbers<[1], [0], [0], [1], [0, 0, 1, 1], [], []>} : vector<8x128xf32>, vector<128x128xf32>, vector<8x128xf32> -> vector<8x128xf32>
    %cst_3 = arith.constant 0.000000e+00 : f32
    %3 = vector.broadcast %cst_3 : f32 to vector<8x128xf32>
    %4 = arith.maximumf %2, %3 : vector<8x128xf32>
    %c0_4 = arith.constant 0 : index
    %c0_5 = arith.constant 0 : index
    %5 = vector.load %arg3[%c0_4, %c0_5] : memref<128x128xf32, #tpu.memory_space<vmem>>, vector<128x128xf32>
    %cst_6 = arith.constant dense<0.000000e+00> : vector<8x128xf32>
    %6 = tpu.matmul %4, %5, %cst_6 {dimension_numbers = #tpu.dot_dimension_numbers<[1], [0], [0], [1], [0, 0, 1, 1], [], []>} : vector<8x128xf32>, vector<128x128xf32>, vector<8x128xf32> -> vector<8x128xf32>
    %c0_7 = arith.constant 0 : index
    %c0_8 = arith.constant 0 : index
    %7 = vector.load %arg4[%c0_7, %c0_8] : memref<128x128xf32, #tpu.memory_space<vmem>>, vector<128x128xf32>
    %cst_9 = arith.constant dense<0.000000e+00> : vector<8x128xf32>
    %8 = tpu.matmul %6, %7, %cst_9 {dimension_numbers = #tpu.dot_dimension_numbers<[1], [0], [0], [1], [0, 0, 1, 1], [], []>} : vector<8x128xf32>, vector<128x128xf32>, vector<8x128xf32> -> vector<8x128xf32>
    %cst_10 = arith.constant 0.000000e+00 : f32
    %9 = vector.broadcast %cst_10 : f32 to vector<8x128xf32>
    %10 = arith.maximumf %8, %9 : vector<8x128xf32>
    %c0_11 = arith.constant 0 : index
    %c0_12 = arith.constant 0 : index
    %11 = vector.load %arg5[%c0_11, %c0_12] : memref<128x128xf32, #tpu.memory_space<vmem>>, vector<128x128xf32>
    %cst_13 = arith.constant dense<0.000000e+00> : vector<8x128xf32>
    %12 = tpu.matmul %10, %11, %cst_13 {dimension_numbers = #tpu.dot_dimension_numbers<[1], [0], [0], [1], [0, 0, 1, 1], [], []>} : vector<8x128xf32>, vector<128x128xf32>, vector<8x128xf32> -> vector<8x128xf32>
    %c0_14 = arith.constant 0 : index
    %c0_15 = arith.constant 0 : index
    %13 = vector.load %arg6[%c0_14, %c0_15] : memref<128x128xf32, #tpu.memory_space<vmem>>, vector<128x128xf32>
    %cst_16 = arith.constant dense<0.000000e+00> : vector<8x128xf32>
    %14 = tpu.matmul %12, %13, %cst_16 {dimension_numbers = #tpu.dot_dimension_numbers<[1], [0], [0], [1], [0, 0, 1, 1], [], []>} : vector<8x128xf32>, vector<128x128xf32>, vector<8x128xf32> -> vector<8x128xf32>
    %cst_17 = arith.constant 0.000000e+00 : f32
    %15 = vector.broadcast %cst_17 : f32 to vector<8x128xf32>
    %16 = arith.maximumf %14, %15 : vector<8x128xf32>
    %c0_18 = arith.constant 0 : index
    %c0_19 = arith.constant 0 : index
    %17 = vector.load %arg7[%c0_18, %c0_19] : memref<128x128xf32, #tpu.memory_space<vmem>>, vector<128x128xf32>
    %cst_20 = arith.constant dense<0.000000e+00> : vector<8x128xf32>
    %18 = tpu.matmul %16, %17, %cst_20 {dimension_numbers = #tpu.dot_dimension_numbers<[1], [0], [0], [1], [0, 0, 1, 1], [], []>} : vector<8x128xf32>, vector<128x128xf32>, vector<8x128xf32> -> vector<8x128xf32>
    %c0_21 = arith.constant 0 : index
    %c0_22 = arith.constant 0 : index
    %19 = vector.load %arg8[%c0_21, %c0_22] : memref<128x128xf32, #tpu.memory_space<vmem>>, vector<128x128xf32>
    %cst_23 = arith.constant dense<0.000000e+00> : vector<8x128xf32>
    %20 = tpu.matmul %18, %19, %cst_23 {dimension_numbers = #tpu.dot_dimension_numbers<[1], [0], [0], [1], [0, 0, 1, 1], [], []>} : vector<8x128xf32>, vector<128x128xf32>, vector<8x128xf32> -> vector<8x128xf32>
    %c0_24 = arith.constant 0 : index
    %c0_25 = arith.constant 0 : index
    %21 = vector.load %arg9[%c0_24, %c0_25] : memref<8x128xf32, #tpu.memory_space<vmem>>, vector<8x128xf32>
    tpu.vector_store %arg9[%c0_24, %c0_25], %20 {strides = array<i32>} : memref<8x128xf32, #tpu.memory_space<vmem>>, vector<8x128xf32>,
    return
  }
  func.func @transform_0(%arg0: i32) -> (i32, i32) {
    %c0_i32 = arith.constant 0 : i32
    %c0_i32_0 = arith.constant 0 : i32
    return %arg0, %c0_i32 : i32, i32
  }
  func.func @transform_1(%arg0: i32) -> (i32, i32) {
    %c0_i32 = arith.constant 0 : i32
    %c0_i32_0 = arith.constant 0 : i32
    %c0_i32_1 = arith.constant 0 : i32
    return %c0_i32, %c0_i32_0 : i32, i32
  }
  func.func @transform_2(%arg0: i32) -> (i32, i32) {
    %c0_i32 = arith.constant 0 : i32
    %c0_i32_0 = arith.constant 0 : i32
    %c0_i32_1 = arith.constant 0 : i32
    return %c0_i32, %c0_i32_0 : i32, i32
  }
  func.func @transform_3(%arg0: i32) -> (i32, i32) {
    %c0_i32 = arith.constant 0 : i32
    %c0_i32_0 = arith.constant 0 : i32
    %c0_i32_1 = arith.constant 0 : i32
    return %c0_i32, %c0_i32_0 : i32, i32
  }
  func.func @transform_4(%arg0: i32) -> (i32, i32) {
    %c0_i32 = arith.constant 0 : i32
    %c0_i32_0 = arith.constant 0 : i32
    %c0_i32_1 = arith.constant 0 : i32
    return %c0_i32, %c0_i32_0 : i32, i32
  }
  func.func @transform_5(%arg0: i32) -> (i32, i32) {
    %c0_i32 = arith.constant 0 : i32
    %c0_i32_0 = arith.constant 0 : i32
    %c0_i32_1 = arith.constant 0 : i32
    return %c0_i32, %c0_i32_0 : i32, i32
  }
  func.func @transform_6(%arg0: i32) -> (i32, i32) {
    %c0_i32 = arith.constant 0 : i32
    %c0_i32_0 = arith.constant 0 : i32
    %c0_i32_1 = arith.constant 0 : i32
    return %c0_i32, %c0_i32_0 : i32, i32
  }
  func.func @transform_7(%arg0: i32) -> (i32, i32) {
    %c0_i32 = arith.constant 0 : i32
    %c0_i32_0 = arith.constant 0 : i32
    %c0_i32_1 = arith.constant 0 : i32
    return %c0_i32, %c0_i32_0 : i32, i32
  }
  func.func @transform_8(%arg0: i32) -> (i32, i32) {
    %c0_i32 = arith.constant 0 : i32
    %c0_i32_0 = arith.constant 0 : i32
    return %arg0, %c0_i32 : i32, i32
  }
}

</mosaic_0001>

<bundles_post_ra>
// kernel: tpu_custom_call.1
= control target key start
LH: loop header
LB: loop body
LE: loop exit
PB: predicated region body
PF: predicated region fallthrough
CT: control target
= control target key end

     0   :  { %13 = vsyncpa [#allocation3], 0  ;;  %s1777_s0 = inlined_call_operand.hbm [shape: f32[8,128], index: 0, kind: input, shape index: {}]   ;;  %s1778_s1 = inlined_call_operand.hbm [shape: f32[128,128], index: 1, kind: input, shape index: {}]   ;;  %s1779_s2 = inlined_call_operand.hbm [shape: f32[128,128], index: 2, kind: input, shape index: {}]   ;;  %s1780_s3 = inlined_call_operand.hbm [shape: f32[128,128], index: 3, kind: input, shape index: {}]   ;;  %s1781_s4 = inlined_call_operand.hbm [shape: f32[128,128], index: 4, kind: input, shape index: {}]   ;;  %s1782_s5 = inlined_call_operand.hbm [shape: f32[128,128], index: 5, kind: input, shape index: {}]   ;;  %s1783_s6 = inlined_call_operand.hbm [shape: f32[128,128], index: 6, kind: input, shape index: {}]   ;;  %s1784_s7 = inlined_call_operand.hbm [shape: f32[128,128], index: 7, kind: input, shape index: {}]   ;;  %s1785_s8 = inlined_call_operand.hbm [shape: f32[8,128], index: 8, kind: output, shape index: {}]  }
   0x1   :  { %14 = vsyncpa [#allocation6], 0 }
   0x2   :  { %15 = vsyncpa [#allocation9], 0 }
   0x3   :  { %16 = vsyncpa [#allocation12], 0 }
   0x4   :  { %17 = vsyncpa [#allocation15], 0 }
   0x5   :  { %18 = vsyncpa [#allocation4], 0  ;;  %s1519_s27 = smov [#allocation5]   ;;  %s1309_s9 = scalar_lea.hbm %s1778_s1, 2048 }
   0x6   :  { %s34_s28 = sshll.u32 %s1519_s27, 4  ;;  %p1310_p0 = scmp.ne.s32.totalorder %s1778_s1, %s1309_s9  ;;  %s35_s28 = int_to_ptr.vmem [resolvable:$true] %s34_s28 }
   0x7   :  { %p1313_p1 = scmp.lt.u32.totalorder %s1309_s9, %s1778_s1 }
   0x9   :  { %p1315_p2 = pnand %p1313_p1, %p1310_p0 }
   0xb   :  { %1318 = shalt.err (!%p1315_p2)
}
   0xc   :  { %s1319_s14 = scalar_lea.vmem %s35_s28, 2048  ;;  %p1324_p4 = scmp.lt.s32.totalorder %s35_s28, %s35_s28 }
   0xd   :  { %p1320_p3 = scmp.ne.s32.totalorder %s35_s28, %s1319_s14  ;;  %p1325_p5 = scmp.lt.s32.totalorder %s1319_s14, %s1319_s14 }
   0xf   :  { %p1326_p6 = por %p1325_p5, %p1324_p4 }
  0x11   :  { %p1327_p7 = pnand %p1326_p6, %p1320_p3 }
  0x13   :  { %1330 = shalt.err (!%p1327_p7)
}
  0x14   :  { %s1520_s15 = smov 128   ;;  %s1521_s16 = smov 8  }
  0x15   :  { %40 = dma.hbm_to_vmem [thread:$0]  %s1778_s1, 2048, %s35_s28, [#allocation6], %s1520_s15, %s1520_s15, %s1521_s16  }
  0x16   :  { %s1522_s19 = smov [#allocation8]   ;;  %s1523_s21 = smov [#allocation11]  }
  0x17   :  { %s58_s20 = sshll.u32 %s1522_s19, 4  ;;  %s82_s22 = sshll.u32 %s1523_s21, 4  ;;  %s59_s20 = int_to_ptr.vmem [resolvable:$true] %s58_s20  ;;  %s83_s22 = int_to_ptr.vmem [resolvable:$true] %s82_s22 }
  0x18   :  { %s1331_s25 = scalar_lea.hbm %s1780_s3, 2048 }
  0x19   :  { %p1332_p8 = scmp.ne.s32.totalorder %s1780_s3, %s1331_s25  ;;  %p1335_p9 = scmp.lt.u32.totalorder %s1331_s25, %s1780_s3 }
  0x1b   :  { %p1337_p10 = pnand %p1335_p9, %p1332_p8 }
  0x1d   :  { %1340 = shalt.err (!%p1337_p10)
}
  0x1e   :  { %s1341_s1 = scalar_lea.vmem %s59_s20, 2048  ;;  %p1346_p12 = scmp.lt.s32.totalorder %s59_s20, %s59_s20 }
  0x1f   :  { %p1342_p11 = scmp.ne.s32.totalorder %s59_s20, %s1341_s1  ;;  %p1347_p13 = scmp.lt.s32.totalorder %s1341_s1, %s1341_s1 }
  0x21   :  { %p1348_p0 = por %p1347_p13, %p1346_p12 }
  0x23   :  { %p1349_p1 = pnand %p1348_p0, %p1342_p11 }
  0x25   :  { %1352 = shalt.err (!%p1349_p1)
}
  0x26   :  { %64 = dma.hbm_to_vmem [thread:$0]  %s1780_s3, 2048, %s59_s20, [#allocation9], %s1520_s15, %s1520_s15, %s1521_s16  }
  0x27   :  { %s1353_s12 = scalar_lea.hbm %s1782_s5, 2048 }
  0x28   :  { %p1354_p2 = scmp.ne.s32.totalorder %s1782_s5, %s1353_s12  ;;  %p1357_p3 = scmp.lt.u32.totalorder %s1353_s12, %s1782_s5 }
  0x2a   :  { %p1359_p4 = pnand %p1357_p3, %p1354_p2 }
  0x2c   :  { %1362 = shalt.err (!%p1359_p4)
}
  0x2d   :  { %s1363_s19 = scalar_lea.vmem %s83_s22, 2048  ;;  %p1368_p6 = scmp.lt.s32.totalorder %s83_s22, %s83_s22 }
  0x2e   :  { %p1364_p5 = scmp.ne.s32.totalorder %s83_s22, %s1363_s19  ;;  %p1369_p7 = scmp.lt.s32.totalorder %s1363_s19, %s1363_s19 }
  0x30   :  { %p1370_p8 = por %p1369_p7, %p1368_p6 }
  0x32   :  { %p1371_p9 = pnand %p1370_p8, %p1364_p5 }
  0x34   :  { %1374 = shalt.err (!%p1371_p9)
}
  0x35   :  { %88 = dma.hbm_to_vmem [thread:$0]  %s1782_s5, 2048, %s83_s22, [#allocation12], %s1520_s15, %s1520_s15, %s1521_s16  }
  0x36   :  { %s1524_s21 = smov [#allocation2]   ;;  %s1525_s24 = smov [#allocation7]  }
  0x37   :  { %s25_s23 = sshll.u32 %s1524_s21, 4  ;;  %s46_s25 = sshll.u32 %s1525_s24, 4  ;;  %s26_s23 = int_to_ptr.vmem [resolvable:$true] %s25_s23  ;;  %s47_s25 = int_to_ptr.vmem [resolvable:$true] %s46_s25 }
  0x38   :  { %s1375_s29 = scalar_lea.hbm %s1777_s0, 128 }
  0x39   :  { %p1376_p10 = scmp.ne.s32.totalorder %s1777_s0, %s1375_s29  ;;  %p1379_p11 = scmp.lt.u32.totalorder %s1375_s29, %s1777_s0 }
  0x3b   :  { %p1381_p12 = pnand %p1379_p11, %p1376_p10 }
  0x3d   :  { %1384 = shalt.err (!%p1381_p12)
}
  0x3e   :  { %s1385_s5 = scalar_lea.vmem %s26_s23, 128  ;;  %p1390_p0 = scmp.lt.s32.totalorder %s26_s23, %s26_s23 }
  0x3f   :  { %p1386_p13 = scmp.ne.s32.totalorder %s26_s23, %s1385_s5  ;;  %p1391_p1 = scmp.lt.s32.totalorder %s1385_s5, %s1385_s5 }
  0x41   :  { %p1392_p2 = por %p1391_p1, %p1390_p0 }
  0x43   :  { %p1393_p3 = pnand %p1392_p2, %p1386_p13 }
  0x45   :  { %1396 = shalt.err (!%p1393_p3)
}
  0x46   :  { %28 = dma.hbm_to_vmem [thread:$0]  %s1777_s0, 128, %s26_s23, [#allocation3]  }
  0x47   :  { %s1397_s13 = scalar_lea.hbm %s1779_s2, 2048 }
  0x48   :  { %p1398_p4 = scmp.ne.s32.totalorder %s1779_s2, %s1397_s13  ;;  %p1401_p5 = scmp.lt.u32.totalorder %s1397_s13, %s1779_s2 }
  0x4a   :  { %p1403_p6 = pnand %p1401_p5, %p1398_p4 }
  0x4c   :  { %1406 = shalt.err (!%p1403_p6)
}
  0x4d   :  { %s1407_s3 = scalar_lea.vmem %s47_s25, 2048  ;;  %p1412_p8 = scmp.lt.s32.totalorder %s47_s25, %s47_s25 }
  0x4e   :  { %p1408_p7 = scmp.ne.s32.totalorder %s47_s25, %s1407_s3  ;;  %p1413_p9 = scmp.lt.s32.totalorder %s1407_s3, %s1407_s3 }
  0x50   :  { %p1414_p10 = por %p1413_p9, %p1412_p8 }
  0x52   :  { %p1415_p11 = pnand %p1414_p10, %p1408_p7 }
  0x54   :  { %1418 = shalt.err (!%p1415_p11)
}
  0x55   :  { %52 = dma.hbm_to_vmem [thread:$0]  %s1779_s2, 2048, %s47_s25, [#allocation6], %s1520_s15, %s1520_s15, %s1521_s16  }
  0x56   :  { %s1526_s21 = smov [#allocation10]   ;;  %s1527_s24 = smov [#allocation13]  }
  0x57   :  { %s70_s23 = sshll.u32 %s1526_s21, 4  ;;  %s94_s26 = sshll.u32 %s1527_s24, 4  ;;  %s71_s23 = int_to_ptr.vmem [resolvable:$true] %s70_s23  ;;  %s95_s26 = int_to_ptr.vmem [resolvable:$true] %s94_s26 }
  0x58   :  { %s1419_s30 = scalar_lea.hbm %s1781_s4, 2048 }
  0x59   :  { %p1420_p12 = scmp.ne.s32.totalorder %s1781_s4, %s1419_s30  ;;  %p1423_p13 = scmp.lt.u32.totalorder %s1419_s30, %s1781_s4 }
  0x5b   :  { %p1425_p0 = pnand %p1423_p13, %p1420_p12 }
  0x5d   :  { %1428 = shalt.err (!%p1425_p0)
}
  0x5e   :  { %s1429_s2 = scalar_lea.vmem %s71_s23, 2048  ;;  %p1434_p2 = scmp.lt.s32.totalorder %s71_s23, %s71_s23 }
  0x5f   :  { %p1430_p1 = scmp.ne.s32.totalorder %s71_s23, %s1429_s2  ;;  %p1435_p3 = scmp.lt.s32.totalorder %s1429_s2, %s1429_s2 }
  0x61   :  { %p1436_p4 = por %p1435_p3, %p1434_p2 }
  0x63   :  { %p1437_p5 = pnand %p1436_p4, %p1430_p1 }
  0x65   :  { %1440 = shalt.err (!%p1437_p5)
}
  0x66   :  { %76 = dma.hbm_to_vmem [thread:$0]  %s1781_s4, 2048, %s71_s23, [#allocation9], %s1520_s15, %s1520_s15, %s1521_s16  }
  0x67   :  { %s1441_s12 = scalar_lea.hbm %s1783_s6, 2048 }
  0x68   :  { %p1442_p6 = scmp.ne.s32.totalorder %s1783_s6, %s1441_s12  ;;  %p1445_p7 = scmp.lt.u32.totalorder %s1441_s12, %s1783_s6 }
  0x6a   :  { %p1447_p8 = pnand %p1445_p7, %p1442_p6 }
  0x6c   :  { %1450 = shalt.err (!%p1447_p8)
}
  0x6d   :  { %s1451_s19 = scalar_lea.vmem %s95_s26, 2048  ;;  %p1456_p10 = scmp.lt.s32.totalorder %s95_s26, %s95_s26 }
  0x6e   :  { %p1452_p9 = scmp.ne.s32.totalorder %s95_s26, %s1451_s19  ;;  %p1457_p11 = scmp.lt.s32.totalorder %s1451_s19, %s1451_s19 }
  0x70   :  { %p1458_p12 = por %p1457_p11, %p1456_p10 }
  0x72   :  { %p1459_p13 = pnand %p1458_p12, %p1452_p9 }
  0x74   :  { %1462 = shalt.err (!%p1459_p13)
}
  0x75   :  { %100 = dma.hbm_to_vmem [thread:$0]  %s1783_s6, 2048, %s95_s26, [#allocation12], %s1520_s15, %s1520_s15, %s1521_s16  }
  0x76   :  { %s1528_s0 = smov [#allocation14]   ;;  %s1463_s24 = scalar_lea.hbm %s1784_s7, 2048 }
  0x77   :  { %s106_s20 = sshll.u32 %s1528_s0, 4  ;;  %p1464_p0 = scmp.ne.s32.totalorder %s1784_s7, %s1463_s24  ;;  %s107_s20 = int_to_ptr.vmem [resolvable:$true] %s106_s20 }
  0x78   :  { %p1467_p1 = scmp.lt.u32.totalorder %s1463_s24, %s1784_s7 }
  0x7a   :  { %p1469_p2 = pnand %p1467_p1, %p1464_p0 }
  0x7c   :  { %1472 = shalt.err (!%p1469_p2)
}
  0x7d   :  { %s1473_s28 = scalar_lea.vmem %s107_s20, 2048  ;;  %p1478_p4 = scmp.lt.s32.totalorder %s107_s20, %s107_s20 }
  0x7e   :  { %p1474_p3 = scmp.ne.s32.totalorder %s107_s20, %s1473_s28  ;;  %p1479_p5 = scmp.lt.s32.totalorder %s1473_s28, %s1473_s28 }
  0x80   :  { %p1480_p6 = por %p1479_p5, %p1478_p4 }
  0x82   :  { %p1481_p7 = pnand %p1480_p6, %p1474_p3 }
  0x84   :  { %1484 = shalt.err (!%p1481_p7)
}
  0x85   :  { %112 = dma.hbm_to_vmem [thread:$0]  %s1784_s7, 2048, %s107_s20, [#allocation15], %s1520_s15, %s1520_s15, %s1521_s16  }
  0x86   :  { %1507 = dma.done.wait [#allocation3], 128  }
  0x87   :  { %1508 = vsyncadd [#allocation3], 4294967168 }
  0x88   :  { %1509 = dma.done.wait [#allocation6], 4096  }
  0x89   :  { %1510 = vsyncadd [#allocation6], 4294963200 }
  0x8a   :  { %1511 = dma.done.wait [#allocation9], 4096  }
  0x8b   :  { %1512 = vsyncadd [#allocation9], 4294963200 }
  0x8c   :  { %1513 = dma.done.wait [#allocation12], 4096  }
  0x8d   :  { %1514 = vsyncadd [#allocation12], 4294963200 }
  0x8e   :  { %1515 = dma.done.wait [#allocation15], 2048  }
  0x8f   :  { %1516 = vsyncadd [#allocation15], 4294965248  ;;  %v1529_v0 = vmov 0.0|0.0   ;;  %vm1530_vm0 = vmmov 0   ;;  %v1531_v1 = vmov 0.0   ;;  %v138_v2 = vld [vmem:[#allocation5] sm:$0xff] }
  0x90   :  { %1127 = vmatprep.subr.bf16.mxu0 %v1529_v0  ;;  %914 = vmatprep.mubr.msk.f32.mxu0 %vm1530_vm0, %v1531_v1  ;;  %v139_v3 = vld [vmem:[#allocation5 + $0x8] sm:$0xff]  ;;  %v140_v4 = vld [vmem:[#allocation5 + $0x10] sm:$0xff]  ;;  %v141_v6 = vld [vmem:[#allocation5 + $0x18] sm:$0xff]  ;;  %s1532_s7 = smov [#allocation16]  }
  0x91   :  { %1151 = vmatprep.subr.bf16.mxu1 %v1529_v0  ;;  %949 = vmatprep.mubr.msk.f32.mxu1 %vm1530_vm0, %v1531_v1  ;;  %v1128_v5 = vpack.c.bf16 %v139_v3, %v138_v2  ;;  %v1131_v7 = vpack.c.bf16 %v141_v6, %v140_v4  ;;  %v142_v8 = vld [vmem:[#allocation5 + $0x20] sm:$0xff]  ;;  %v143_v9 = vld [vmem:[#allocation5 + $0x28] sm:$0xff]  ;;  %v227_v12 = vld [vmem:[#allocation7 + $0x10] sm:$0xff]  ;;  %s750_s15 = sshll.u32 %s1532_s7, 4  ;;  %s751_s15 = int_to_ptr.vmem [resolvable:$true] %s750_s15 }
  0x92   :  { %v225_v10 = vld [vmem:[#allocation7] sm:$0xff]  ;;  %v226_v11 = vld [vmem:[#allocation7 + $0x8] sm:$0xff]  ;;  %v228_v13 = vld [vmem:[#allocation7 + $0x18] sm:$0xff]  ;;  %v1134_v14 = vpack.c.bf16 %v143_v9, %v142_v8  ;;  %s1485_s16 = scalar_lea.vmem %s751_s15, 128  ;;  %p1490_p9 = scmp.lt.s32.totalorder %s751_s15, %s751_s15 }
  0x93   :  { %1129 = vmatpush3.bf16.msra.mxu0 %v1128_v5  ;;  %v1152_v15 = vpack.c.bf16 %v226_v11, %v225_v10  ;;  %v144_v16 = vld [vmem:[#allocation5 + $0x30] sm:$0xff]  ;;  %v145_v17 = vld [vmem:[#allocation5 + $0x38] sm:$0xff]  ;;  %v1155_v18 = vpack.c.bf16 %v228_v13, %v227_v12  ;;  %v229_v19 = vld [vmem:[#allocation7 + $0x20] sm:$0xff]  ;;  %p1486_p8 = scmp.ne.s32.totalorder %s751_s15, %s1485_s16  ;;  %p1491_p10 = scmp.lt.s32.totalorder %s1485_s16, %s1485_s16 }
  0x94   :  { %1130 = vmatprep.subr.bf16.mxu0 %v1529_v0  ;;  %v230_v20 = vld [vmem:[#allocation7 + $0x28] sm:$0xff]  ;;  %v1137_v21 = vpack.c.bf16 %v145_v17, %v144_v16  ;;  %v146_v22 = vld [vmem:[#allocation5 + $0x40] sm:$0xff]  ;;  %v231_v25 = vld [vmem:[#allocation7 + $0x30] sm:$0xff] }
  0x95   :  { %1153 = vmatpush3.bf16.msra.mxu1 %v1152_v15  ;;  %v147_v23 = vld [vmem:[#allocation5 + $0x48] sm:$0xff]  ;;  %v1158_v24 = vpack.c.bf16 %v230_v20, %v229_v19  ;;  %v232_v26 = vld [vmem:[#allocation7 + $0x38] sm:$0xff]  ;;  %v148_v28 = vld [vmem:[#allocation5 + $0x50] sm:$0xff]  ;;  %p1492_p11 = por %p1491_p10, %p1490_p9 }
  0x96   :  { %1154 = vmatprep.subr.bf16.mxu1 %v1529_v0  ;;  %v1140_v27 = vpack.c.bf16 %v147_v23, %v146_v22  ;;  %v149_v29 = vld [vmem:[#allocation5 + $0x58] sm:$0xff]  ;;  %v1161_v30 = vpack.c.bf16 %v232_v26, %v231_v25  ;;  %v233_v31 = vld [vmem:[#allocation7 + $0x40] sm:$0xff]  ;;  %v234_v32 = vld [vmem:[#allocation7 + $0x48] sm:$0xff] }
  0x97   :  { %1132 = vmatpush3.bf16.msra.mxu0 %v1131_v7  ;;  %v1143_v33 = vpack.c.bf16 %v149_v29, %v148_v28  ;;  %v150_v34 = vld [vmem:[#allocation5 + $0x60] sm:$0xff]  ;;  %v151_v35 = vld [vmem:[#allocation5 + $0x68] sm:$0xff]  ;;  %v1164_v36 = vpack.c.bf16 %v234_v32, %v233_v31  ;;  %v235_v37 = vld [vmem:[#allocation7 + $0x50] sm:$0xff]  ;;  %p1493_p12 = pnand %p1492_p11, %p1486_p8 }
  0x98   :  { %1133 = vmatprep.subr.bf16.mxu0 %v1529_v0  ;;  %v236_v38 = vld [vmem:[#allocation7 + $0x58] sm:$0xff]  ;;  %v1146_v39 = vpack.c.bf16 %v151_v35, %v150_v34  ;;  %v152_v40 = vld [vmem:[#allocation5 + $0x70] sm:$0xff]  ;;  %v237_v43 = vld [vmem:[#allocation7 + $0x60] sm:$0xff] }
  0x99   :  { %1156 = vmatpush3.bf16.msra.mxu1 %v1155_v18  ;;  %v153_v41 = vld [vmem:[#allocation5 + $0x78] sm:$0xff]  ;;  %v1167_v42 = vpack.c.bf16 %v236_v38, %v235_v37  ;;  %v238_v44 = vld [vmem:[#allocation7 + $0x68] sm:$0xff]  ;;  %v239_v48 = vld [vmem:[#allocation7 + $0x70] sm:$0xff] }
  0x9a   :  { %1157 = vmatprep.subr.bf16.mxu1 %v1529_v0  ;;  %v1149_v45 = vpack.c.bf16 %v153_v41, %v152_v40  ;;  %v1170_v46 = vpack.c.bf16 %v238_v44, %v237_v43  ;;  %v137_v47 = vld [vmem:[#allocation2] sm:$0xff]  ;;  %v311_v51 = vld [vmem:[#allocation8] sm:$0xff]  ;;  %v312_v52 = vld [vmem:[#allocation8 + $0x8] sm:$0xff] }
  0x9b   :  { %1135 = vmatpush3.bf16.msra.mxu0 %v1134_v14  ;;  %v240_v49 = vld [vmem:[#allocation7 + $0x78] sm:$0xff]  ;;  %v313_v53 = vld [vmem:[#allocation8 + $0x10] sm:$0xff]  ;;  %v1176_v54 = vpack.c.bf16 %v312_v52, %v311_v51  ;;  %v315_v57 = vld [vmem:[#allocation8 + $0x20] sm:$0xff] }
  0x9c   :  { %1136 = vmatprep.subr.bf16.mxu0 %v1529_v0  ;;  %v1173_v50 = vpack.c.bf16 %v240_v49, %v239_v48  ;;  %v314_v55 = vld [vmem:[#allocation8 + $0x18] sm:$0xff]  ;;  %v316_v58 = vld [vmem:[#allocation8 + $0x28] sm:$0xff]  ;;  %v317_v60 = vld [vmem:[#allocation8 + $0x30] sm:$0xff] }
  0x9d   :  { %1159 = vmatpush3.bf16.msra.mxu1 %v1158_v24  ;;  %v1179_v56 = vpack.c.bf16 %v314_v55, %v313_v53  ;;  %v1182_v59 = vpack.c.bf16 %v316_v58, %v315_v57  ;;  %v318_v61 = vld [vmem:[#allocation8 + $0x38] sm:$0xff]  ;;  %v319_v63 = vld [vmem:[#allocation8 + $0x40] sm:$0xff]  ;;  %v320_v2 = vld [vmem:[#allocation8 + $0x48] sm:$0xff] }
  0x9e   :  { %1160 = vmatprep.subr.bf16.mxu1 %v1529_v0  ;;  %v1185_v62 = vpack.c.bf16 %v318_v61, %v317_v60  ;;  %v1188_v3 = vpack.c.bf16 %v320_v2, %v319_v63  ;;  %v321_v4 = vld [vmem:[#allocation8 + $0x50] sm:$0xff]  ;;  %v322_v5 = vld [vmem:[#allocation8 + $0x58] sm:$0xff]  ;;  %v323_v7 = vld [vmem:[#allocation8 + $0x60] sm:$0xff] }
  0x9f   :  { %1138 = vmatpush3.bf16.msra.mxu0 %v1137_v21  ;;  %v1191_v6 = vpack.c.bf16 %v322_v5, %v321_v4  ;;  %v324_v8 = vld [vmem:[#allocation8 + $0x68] sm:$0xff]  ;;  %v325_v10 = vld [vmem:[#allocation8 + $0x70] sm:$0xff]  ;;  %v326_v11 = vld [vmem:[#allocation8 + $0x78] sm:$0xff] }
  0xa0   :  { %1139 = vmatprep.subr.bf16.mxu0 %v1529_v0  ;;  %v1194_v9 = vpack.c.bf16 %v324_v8, %v323_v7  ;;  %v1197_v12 = vpack.c.bf16 %v326_v11, %v325_v10  ;;  %v398_v16 = vld [vmem:[#allocation10] sm:$0xff]  ;;  %v399_v17 = vld [vmem:[#allocation10 + $0x8] sm:$0xff]  ;;  %v400_v18 = vld [vmem:[#allocation10 + $0x10] sm:$0xff] }
  0xa1   :  { %1162 = vmatpush3.bf16.msra.mxu1 %v1161_v30  ;;  %v1200_v19 = vpack.c.bf16 %v399_v17, %v398_v16  ;;  %v401_v20 = vld [vmem:[#allocation10 + $0x18] sm:$0xff]  ;;  %v402_v22 = vld [vmem:[#allocation10 + $0x20] sm:$0xff]  ;;  %v403_v23 = vld [vmem:[#allocation10 + $0x28] sm:$0xff] }
  0xa2   :  { %1163 = vmatprep.subr.bf16.mxu1 %v1529_v0  ;;  %v1203_v21 = vpack.c.bf16 %v401_v20, %v400_v18  ;;  %v1206_v24 = vpack.c.bf16 %v403_v23, %v402_v22  ;;  %v404_v25 = vld [vmem:[#allocation10 + $0x30] sm:$0xff]  ;;  %v405_v26 = vld [vmem:[#allocation10 + $0x38] sm:$0xff]  ;;  %v406_v28 = vld [vmem:[#allocation10 + $0x40] sm:$0xff] }
  0xa3   :  { %1141 = vmatpush3.bf16.msra.mxu0 %v1140_v27  ;;  %v1209_v27 = vpack.c.bf16 %v405_v26, %v404_v25  ;;  %v407_v29 = vld [vmem:[#allocation10 + $0x48] sm:$0xff]  ;;  %v408_v31 = vld [vmem:[#allocation10 + $0x50] sm:$0xff]  ;;  %v409_v32 = vld [vmem:[#allocation10 + $0x58] sm:$0xff] }
  0xa4   :  { %1142 = vmatprep.subr.bf16.mxu0 %v1529_v0  ;;  %v1212_v30 = vpack.c.bf16 %v407_v29, %v406_v28  ;;  %v410_v34 = vld [vmem:[#allocation10 + $0x60] sm:$0xff]  ;;  %v411_v35 = vld [vmem:[#allocation10 + $0x68] sm:$0xff]  ;;  %v413_v40 = vld [vmem:[#allocation10 + $0x78] sm:$0xff] }
  0xa5   :  { %1165 = vmatpush3.bf16.msra.mxu1 %v1164_v36  ;;  %v1218_v36 = vpack.c.bf16 %v411_v35, %v410_v34  ;;  %v485_v43 = vld [vmem:[#allocation11 + $0x8] sm:$0xff]  ;;  %v486_v44 = vld [vmem:[#allocation11 + $0x10] sm:$0xff]  ;;  %v488_v48 = vld [vmem:[#allocation11 + $0x20] sm:$0xff] }
  0xa6   :  { %1166 = vmatprep.subr.bf16.mxu1 %v1529_v0  ;;  %v489_v49 = vld [vmem:[#allocation11 + $0x28] sm:$0xff]  ;;  %v490_v51 = vld [vmem:[#allocation11 + $0x30] sm:$0xff]  ;;  %v491_v52 = vld [vmem:[#allocation11 + $0x38] sm:$0xff] }
  0xa7   :  { %1144 = vmatpush3.bf16.msra.mxu0 %v1143_v33  ;;  %v1215_v33 = vpack.c.bf16 %v409_v32, %v408_v31  ;;  %v1233_v53 = vpack.c.bf16 %v491_v52, %v490_v51  ;;  %v493_v55 = vld [vmem:[#allocation11 + $0x48] sm:$0xff]  ;;  %v494_v57 = vld [vmem:[#allocation11 + $0x50] sm:$0xff]  ;;  %v495_v58 = vld [vmem:[#allocation11 + $0x58] sm:$0xff] }
  0xa8   :  { %1145 = vmatprep.subr.bf16.mxu0 %v1529_v0  ;;  %v496_v60 = vld [vmem:[#allocation11 + $0x60] sm:$0xff]  ;;  %v497_v61 = vld [vmem:[#allocation11 + $0x68] sm:$0xff]  ;;  %v498_v63 = vld [vmem:[#allocation11 + $0x70] sm:$0xff] }
  0xa9   :  { %1168 = vmatpush3.bf16.msra.mxu1 %v1167_v42  ;;  %v484_v42 = vld [vmem:[#allocation11] sm:$0xff]  ;;  %v499_v2 = vld [vmem:[#allocation11 + $0x78] sm:$0xff]  ;;  %v572_v8 = vld [vmem:[#allocation13 + $0x8] sm:$0xff] }
  0xaa   :  { %1169 = vmatprep.subr.bf16.mxu1 %v1529_v0  ;;  %v571_v7 = vld [vmem:[#allocation13] sm:$0xff]  ;;  %v574_v11 = vld [vmem:[#allocation13 + $0x18] sm:$0xff]  ;;  %v577_v16 = vld [vmem:[#allocation13 + $0x30] sm:$0xff] }
  0xab   :  { %1147 = vmatpush3.bf16.msra.mxu0 %v1146_v39  ;;  %v412_v39 = vld [vmem:[#allocation10 + $0x70] sm:$0xff]  ;;  %v1248_v10 = vpack.c.bf16 %v572_v8, %v571_v7  ;;  %v578_v17 = vld [vmem:[#allocation13 + $0x38] sm:$0xff]  ;;  %v580_v20 = vld [vmem:[#allocation13 + $0x48] sm:$0xff] }
  0xac   :  { %1148 = vmatprep.subr.bf16.mxu0 %v1529_v0  ;;  %v1221_v41 = vpack.c.bf16 %v413_v40, %v412_v39  ;;  %v1257_v18 = vpack.c.bf16 %v578_v17, %v577_v16  ;;  %v581_v22 = vld [vmem:[#allocation13 + $0x50] sm:$0xff]  ;;  %v582_v23 = vld [vmem:[#allocation13 + $0x58] sm:$0xff]  ;;  %v583_v25 = vld [vmem:[#allocation13 + $0x60] sm:$0xff] }
  0xad   :  { %1171 = vmatpush3.bf16.msra.mxu1 %v1170_v46  ;;  %v487_v46 = vld [vmem:[#allocation11 + $0x18] sm:$0xff]  ;;  %v584_v26 = vld [vmem:[#allocation13 + $0x68] sm:$0xff]  ;;  %v659_v35 = vld [vmem:[#allocation14 + $0x10] sm:$0xff] }
  0xae   :  { %1172 = vmatprep.subr.bf16.mxu1 %v1529_v0  ;;  %v586_v31 = vld [vmem:[#allocation13 + $0x78] sm:$0xff]  ;;  %v658_v34 = vld [vmem:[#allocation14 + $0x8] sm:$0xff]  ;;  %v661_v39 = vld [vmem:[#allocation14 + $0x20] sm:$0xff] }
  0xaf   :  { %1150 = vmatpush3.bf16.msra.mxu0 %v1149_v45  ;;  %v1224_v45 = vpack.c.bf16 %v485_v43, %v484_v42  ;;  %v662_v40 = vld [vmem:[#allocation14 + $0x28] sm:$0xff]  ;;  %v664_v42 = vld [vmem:[#allocation14 + $0x38] sm:$0xff] }
  0xb0   :  { %1175 = vmatprep.subr.bf16.mxu0 %v1529_v0  ;;  %v670_v51 = vld [vmem:[#allocation14 + $0x68] sm:$0xff] }
  0xb1   :  { %1174 = vmatpush3.bf16.msra.mxu1 %v1173_v50  ;;  %v1230_v50 = vpack.c.bf16 %v489_v49, %v488_v48  ;;  %v668_v48 = vld [vmem:[#allocation14 + $0x58] sm:$0xff] }
  0xb2   :  { %915 = vmatmul.mubr.f32.vlgmr.msra.gmra.mrb[0].mxu0 %v137_v47  ;;  %1199 = vmatprep.subr.bf16.mxu1 %v1529_v0  ;;  %v1227_v47 = vpack.c.bf16 %v487_v46, %v486_v44  ;;  %v665_v44 = vld [vmem:[#allocation14 + $0x40] sm:$0xff] }
  0xb3   :  { %984 = vmatprep.mubr.msk.f32.mxu0 %vm1530_vm0, %v1531_v1  ;;  %1177 = vmatpush3.bf16.msra.mxu0 %v1176_v54  ;;  %v492_v54 = vld [vmem:[#allocation11 + $0x40] sm:$0xff] }
  0xb4   :  { %1178 = vmatprep.subr.bf16.mxu0 %v1529_v0 }
  0xb7   :  { %1180 = vmatpush3.bf16.msra.mxu0 %v1179_v56  ;;  %v1236_v56 = vpack.c.bf16 %v493_v55, %v492_v54  ;;  %v672_v54 = vld [vmem:[#allocation14 + $0x78] sm:$0xff] }
  0xb8   :  { %1181 = vmatprep.subr.bf16.mxu0 %v1529_v0 }
  0xbb   :  { %1183 = vmatpush3.bf16.msra.mxu0 %v1182_v59  ;;  %v1239_v59 = vpack.c.bf16 %v495_v58, %v494_v57 }
  0xbc   :  { %1184 = vmatprep.subr.bf16.mxu0 %v1529_v0 }
  0xbf   :  { %1186 = vmatpush3.bf16.msra.mxu0 %v1185_v62  ;;  %v1242_v62 = vpack.c.bf16 %v497_v61, %v496_v60 }
  0xc0   :  { %1187 = vmatprep.subr.bf16.mxu0 %v1529_v0 }
  0xc3   :  { %1189 = vmatpush3.bf16.msra.mxu0 %v1188_v3  ;;  %v1245_v3 = vpack.c.bf16 %v499_v2, %v498_v63 }
  0xc4   :  { %1190 = vmatprep.subr.bf16.mxu0 %v1529_v0 }
  0xc7   :  { %1192 = vmatpush3.bf16.msra.mxu0 %v1191_v6 }
  0xc8   :  { %1193 = vmatprep.subr.bf16.mxu0 %v1529_v0 }
  0xcb   :  { %1195 = vmatpush3.bf16.msra.mxu0 %v1194_v9  ;;  %v573_v9 = vld [vmem:[#allocation13 + $0x10] sm:$0xff] }
  0xcc   :  { %1196 = vmatprep.subr.bf16.mxu0 %v1529_v0 }
  0xcf   :  { %1198 = vmatpush3.bf16.msra.mxu0 %v1197_v12  ;;  %v1251_v12 = vpack.c.bf16 %v574_v11, %v573_v9 }
  0xd0   :  { %1223 = vmatprep.subr.bf16.mxu0 %v1529_v0 }
 0x185   :  { %v220_v13 = vpop.f32.mrb[0].mxu0 }
 0x186   :  { %v224_v14 = vmax.f32 %v220_v13, 0.0  ;;  %v916_v15 = vpop.f32.mrb[1].mxu0  ;;  %v575_v13 = vld [vmem:[#allocation13 + $0x20] sm:$0xff] }
 0x188   :  { %950 = vmatmul.mubr.f32.vlgmr.msra.gmra.mrb[0].mxu1 %v224_v14  ;;  %v576_v14 = vld [vmem:[#allocation13 + $0x28] sm:$0xff] }
 0x189   :  { %1019 = vmatprep.mubr.msk.f32.mxu1 %vm1530_vm0, %v1531_v1  ;;  %1201 = vmatpush3.bf16.msra.mxu1 %v1200_v19  ;;  %v1254_v15 = vpack.c.bf16 %v576_v14, %v575_v13  ;;  %v579_v19 = vld [vmem:[#allocation13 + $0x40] sm:$0xff] }
 0x18a   :  { %1202 = vmatprep.subr.bf16.mxu1 %v1529_v0 }
 0x18d   :  { %1204 = vmatpush3.bf16.msra.mxu1 %v1203_v21  ;;  %v1260_v21 = vpack.c.bf16 %v580_v20, %v579_v19 }
 0x18e   :  { %1205 = vmatprep.subr.bf16.mxu1 %v1529_v0 }
 0x191   :  { %1207 = vmatpush3.bf16.msra.mxu1 %v1206_v24  ;;  %v1263_v24 = vpack.c.bf16 %v582_v23, %v581_v22 }
 0x192   :  { %1208 = vmatprep.subr.bf16.mxu1 %v1529_v0 }
 0x195   :  { %1210 = vmatpush3.bf16.msra.mxu1 %v1209_v27  ;;  %v1266_v27 = vpack.c.bf16 %v584_v26, %v583_v25 }
 0x196   :  { %1211 = vmatprep.subr.bf16.mxu1 %v1529_v0 }
 0x199   :  { %1213 = vmatpush3.bf16.msra.mxu1 %v1212_v30  ;;  %v585_v30 = vld [vmem:[#allocation13 + $0x70] sm:$0xff] }
 0x19a   :  { %1214 = vmatprep.subr.bf16.mxu1 %v1529_v0  ;;  %v1269_v32 = vpack.c.bf16 %v586_v31, %v585_v30 }
 0x19d   :  { %1216 = vmatpush3.bf16.msra.mxu1 %v1215_v33  ;;  %v657_v33 = vld [vmem:[#allocation14] sm:$0xff] }
 0x19e   :  { %1217 = vmatprep.subr.bf16.mxu1 %v1529_v0 }
 0x1a1   :  { %1219 = vmatpush3.bf16.msra.mxu1 %v1218_v36  ;;  %v1272_v36 = vpack.c.bf16 %v658_v34, %v657_v33 }
 0x1a2   :  { %1220 = vmatprep.subr.bf16.mxu1 %v1529_v0 }
 0x1a5   :  { %1222 = vmatpush3.bf16.msra.mxu1 %v1221_v41  ;;  %v1278_v41 = vpack.c.bf16 %v662_v40, %v661_v39 }
 0x1a6   :  { %1247 = vmatprep.subr.bf16.mxu1 %v1529_v0 }
 0x25b   :  { %v307_v37 = vpop.f32.mrb[0].mxu1 }
 0x25c   :  { %v951_v38 = vpop.f32.mrb[1].mxu1  ;;  %985 = vmatmul.mubr.f32.vlgmr.msra.gmra.mrb[2].mxu0 %v307_v37  ;;  %v660_v37 = vld [vmem:[#allocation14 + $0x18] sm:$0xff] }
 0x25d   :  { %1054 = vmatprep.mubr.msk.f32.mxu0 %vm1530_vm0, %v1531_v1  ;;  %1225 = vmatpush3.bf16.msra.mxu0 %v1224_v45  ;;  %v1275_v38 = vpack.c.bf16 %v660_v37, %v659_v35  ;;  %v666_v45 = vld [vmem:[#allocation14 + $0x48] sm:$0xff] }
 0x25e   :  { %1226 = vmatprep.subr.bf16.mxu0 %v1529_v0  ;;  %v1284_v46 = vpack.c.bf16 %v666_v45, %v665_v44 }
 0x261   :  { %1228 = vmatpush3.bf16.msra.mxu0 %v1227_v47  ;;  %v667_v47 = vld [vmem:[#allocation14 + $0x50] sm:$0xff] }
 0x262   :  { %1229 = vmatprep.subr.bf16.mxu0 %v1529_v0  ;;  %v1287_v49 = vpack.c.bf16 %v668_v48, %v667_v47 }
 0x265   :  { %1231 = vmatpush3.bf16.msra.mxu0 %v1230_v50  ;;  %v669_v50 = vld [vmem:[#allocation14 + $0x60] sm:$0xff] }
 0x266   :  { %1232 = vmatprep.subr.bf16.mxu0 %v1529_v0  ;;  %v1290_v52 = vpack.c.bf16 %v670_v51, %v669_v50 }
 0x269   :  { %1234 = vmatpush3.bf16.msra.mxu0 %v1233_v53  ;;  %v671_v53 = vld [vmem:[#allocation14 + $0x70] sm:$0xff] }
 0x26a   :  { %1235 = vmatprep.subr.bf16.mxu0 %v1529_v0  ;;  %v1293_v55 = vpack.c.bf16 %v672_v54, %v671_v53 }
 0x26d   :  { %1237 = vmatpush3.bf16.msra.mxu0 %v1236_v56 }
 0x26e   :  { %1238 = vmatprep.subr.bf16.mxu0 %v1529_v0 }
 0x271   :  { %1240 = vmatpush3.bf16.msra.mxu0 %v1239_v59 }
 0x272   :  { %1241 = vmatprep.subr.bf16.mxu0 %v1529_v0 }
 0x275   :  { %1243 = vmatpush3.bf16.msra.mxu0 %v1242_v62 }
 0x276   :  { %1244 = vmatprep.subr.bf16.mxu0 %v1529_v0 }
 0x279   :  { %1246 = vmatpush3.bf16.msra.mxu0 %v1245_v3 }
 0x27a   :  { %1271 = vmatprep.subr.bf16.mxu0 %v1529_v0 }
 0x32f   :  { %v393_v4 = vpop.f32.mrb[2].mxu0 }
 0x330   :  { %v397_v5 = vmax.f32 %v393_v4, 0.0  ;;  %v986_v6 = vpop.f32.mrb[3].mxu0 }
 0x332   :  { %1020 = vmatmul.mubr.f32.vlgmr.msra.gmra.mrb[2].mxu1 %v397_v5 }
 0x333   :  { %1089 = vmatprep.mubr.msk.f32.mxu1 %vm1530_vm0, %v1531_v1  ;;  %1249 = vmatpush3.bf16.msra.mxu1 %v1248_v10 }
 0x334   :  { %1250 = vmatprep.subr.bf16.mxu1 %v1529_v0 }
 0x337   :  { %1252 = vmatpush3.bf16.msra.mxu1 %v1251_v12 }
 0x338   :  { %1253 = vmatprep.subr.bf16.mxu1 %v1529_v0 }
 0x33b   :  { %1255 = vmatpush3.bf16.msra.mxu1 %v1254_v15 }
 0x33c   :  { %1256 = vmatprep.subr.bf16.mxu1 %v1529_v0 }
 0x33f   :  { %1258 = vmatpush3.bf16.msra.mxu1 %v1257_v18 }
 0x340   :  { %1259 = vmatprep.subr.bf16.mxu1 %v1529_v0 }
 0x343   :  { %1261 = vmatpush3.bf16.msra.mxu1 %v1260_v21 }
 0x344   :  { %1262 = vmatprep.subr.bf16.mxu1 %v1529_v0 }
 0x347   :  { %1264 = vmatpush3.bf16.msra.mxu1 %v1263_v24 }
 0x348   :  { %1265 = vmatprep.subr.bf16.mxu1 %v1529_v0 }
 0x34b   :  { %1267 = vmatpush3.bf16.msra.mxu1 %v1266_v27 }
 0x34c   :  { %1268 = vmatprep.subr.bf16.mxu1 %v1529_v0 }
 0x34f   :  { %1270 = vmatpush3.bf16.msra.mxu1 %v1269_v32 }
 0x405   :  { %v480_v28 = vpop.f32.mrb[2].mxu1 }
 0x406   :  { %v1021_v29 = vpop.f32.mrb[3].mxu1  ;;  %1055 = vmatmul.mubr.f32.vlgmr.msra.gmra.mrb[4].mxu0 %v480_v28 }
 0x407   :  { %1124 = vmatprep.mubr.msk.f32.mxu0 %vm1530_vm0, %v1531_v1  ;;  %1273 = vmatpush3.bf16.msra.mxu0 %v1272_v36  ;;  %v663_v1 = vld [vmem:[#allocation14 + $0x30] sm:$0xff] }
 0x408   :  { %1274 = vmatprep.subr.bf16.mxu0 %v1529_v0  ;;  %v1281_v43 = vpack.c.bf16 %v664_v42, %v663_v1 }
 0x40b   :  { %1276 = vmatpush3.bf16.msra.mxu0 %v1275_v38 }
 0x40c   :  { %1277 = vmatprep.subr.bf16.mxu0 %v1529_v0 }
 0x40f   :  { %1279 = vmatpush3.bf16.msra.mxu0 %v1278_v41 }
 0x410   :  { %1280 = vmatprep.subr.bf16.mxu0 %v1529_v0 }
 0x413   :  { %1282 = vmatpush3.bf16.msra.mxu0 %v1281_v43 }
 0x414   :  { %1283 = vmatprep.subr.bf16.mxu0 %v1529_v0 }
 0x417   :  { %1285 = vmatpush3.bf16.msra.mxu0 %v1284_v46 }
 0x418   :  { %1286 = vmatprep.subr.bf16.mxu0 %v1529_v0 }
 0x41b   :  { %1288 = vmatpush3.bf16.msra.mxu0 %v1287_v49 }
 0x41c   :  { %1289 = vmatprep.subr.bf16.mxu0 %v1529_v0 }
 0x41f   :  { %1291 = vmatpush3.bf16.msra.mxu0 %v1290_v52 }
 0x420   :  { %1292 = vmatprep.subr.bf16.mxu0 %v1529_v0 }
 0x423   :  { %1294 = vmatpush3.bf16.msra.mxu0 %v1293_v55 }
 0x4d9   :  { %v566_v56 = vpop.f32.mrb[4].mxu0 }
 0x4da   :  { %v570_v57 = vmax.f32 %v566_v56, 0.0  ;;  %v1056_v58 = vpop.f32.mrb[5].mxu0 }
 0x4dc   :  { %1090 = vmatmul.mubr.f32.vlgmr.msra.gmra.mrb[4].mxu1 %v570_v57 }
 0x5af   :  { %v653_v59 = vpop.f32.mrb[4].mxu1 }
 0x5b0   :  { %v1091_v60 = vpop.f32.mrb[5].mxu1  ;;  %1125 = vmatmul.mubr.f32.vlgmr.msra.gmra.mrb[6].mxu0 %v653_v59 }
 0x683   :  { %v739_v61 = vpop.f32.mrb[6].mxu0 }
 0x684   :  { %743 = vst [vmem:[#allocation16] sm:$0xff] %v739_v61  ;;  %v1126_v62 = vpop.f32.mrb[7].mxu0 }
 0x685   :  { %1496 = shalt.err (!%p1493_p12)
}
 0x686   :  { %s1497_s2 = scalar_lea.hbm %s1785_s8, 128 }
 0x687   :  { %p1498_p13 = scmp.ne.s32.totalorder %s1785_s8, %s1497_s2  ;;  %p1501_p0 = scmp.lt.u32.totalorder %s1497_s2, %s1785_s8 }
 0x689   :  { %p1503_p1 = pnand %p1501_p0, %p1498_p13 }
 0x68b   :  { %1506 = shalt.err (!%p1503_p1)
}
 0x68c   :  { %753 = dma.vmem_to_hbm [thread:$0]  %s751_s15, 128, %s1785_s8, [#allocation4]  }
 0x68d   :  { %1517 = dma.done.wait [#allocation4], 128  }
 0x68e   :  { %1518 = vsyncadd [#allocation4], 4294967168 }
 0x68f   :  { %757 = vsyncpa [#allocation3], 1 }
 0x690   :  { %758 = vsyncpa [#allocation6], 1 }
 0x691   :  { %759 = vsyncpa [#allocation9], 1 }
 0x692   :  { %760 = vsyncpa [#allocation12], 1 }
 0x693   :  { %761 = vsyncpa [#allocation15], 1 }
 0x694   :  { %762 = vsyncpa [#allocation4], 1 }

</bundles_post_ra>
